<compile_context>
chip_gen: v5e
topology: v5e:2x2
jax: 0.10.0
libtpu: 0.0.40
codegen_flags: <defaults>
</compile_context>

<pallas_src>
import functools

import jax
import jax.numpy as jnp
from jax.experimental import pallas as pl
from jax.experimental.pallas import tpu as pltpu

# ----------------- GGNNProper hyper-parameters -----------------
TEXT_DIM = 24
SEL_DIM = 8
HIDDEN = TEXT_DIM + SEL_DIM            # 32
FWD_EDGE_TYPES = 2
USE_BACKWARD_EDGES = True
EDGE_TYPES = FWD_EDGE_TYPES * (2 if USE_BACKWARD_EDGES else 1)   # 4
LAYER_TIMESTEPS = [2]
MSG_MEAN_AGG = True

BATCH = 4                              # graphs per pallas_call (grid axis)
N_NODES = 16
EDGES_PER_TYPE = 24
LANE = 128                             # per-block lane stride inside W_big


# ----------------- Pallas kernel: one GGNN layer (MessagingLayer + GRUCell, T steps) ---
def ggnn_layer_kernel(a_ref, h0_ref, invdeg_ref, gibias_ref, wbig_ref, bhn_ref, out_ref,
                      *, num_timesteps, edge_types, hidden):
    n = h0_ref.shape[1]
    d = hidden
    d3 = 3 * d
    gh_off = edge_types * LANE          # W_hh block starts on a 128-lane boundary

    a = a_ref[0]                        # [E, N, N] bf16 (exact integer edge counts)
    w_big = wbig_ref[...]               # [D, (E+1)*128] bf16: [W_fused_e ... | W_hh], padded
    inv_deg = invdeg_ref[0]             # [N, 1]  f32 (ones if mean-agg disabled)
    gi_bias = gibias_ref[0]             # [N, 3D] f32 (b_ih + scaled edge-bias + b_hh_{r,z})
    # loop-invariant broadcast, hoisted out of the unrolled timestep loop
    b_hn = jnp.broadcast_to(bhn_ref[...], (n, d))   # [N, D] f32 (b_hh n-gate chunk)

    h = h0_ref[0]                       # [N, D] f32

    for _ in range(num_timesteps):
        h_lo = h.astype(jnp.bfloat16)

        # One fused MXU push for every matmul that consumes h:
        #   big[:, e*128 : e*128+3D] = h @ (W_msg_e @ W_ih)   (message path, W_ih folded)
        #   big[:, E*128 : E*128+3D] = h @ W_hh               (GRU hidden path)
        big = jnp.dot(h_lo, w_big, preferred_element_type=jnp.float32)   # [N, (E+1)*128]

        # Scatter-add over edge targets as tiny per-edge-type matmuls (all slices are
        # 128-lane aligned -> no cross-lane relayout; MXU has huge slack at this size).
        gi_pre = jnp.dot(a[0], big[:, 0:LANE].astype(jnp.bfloat16),
                         preferred_element_type=jnp.float32)             # [N, 128]
        for e in range(1, edge_types):
            gi_pre = gi_pre + jnp.dot(
                a[e], big[:, e * LANE:(e + 1) * LANE].astype(jnp.bfloat16),
                preferred_element_type=jnp.float32)

        # Mean aggregation applied in f32 (A holds exact counts), bias terms pre-folded.
        gi = inv_deg * gi_pre[:, :d3] + gi_bias                          # [N, 3D] f32
        gh = big[:, gh_off:gh_off + d3]                                  # [N, 3D] f32 (no bias)

        # ---- torch.nn.GRUCell(messages, node_states), elementwise in f32 ----
        rz = jax.nn.sigmoid(gi[:, :2 * d] + gh[:, :2 * d])   # b_ih+b_hh for r,z in gi_bias
        r = rz[:, :d]
        z = rz[:, d:]
        ng = jnp.tanh(gi[:, 2 * d:] + r * (gh[:, 2 * d:] + b_hn))
        h = ng + z * (h - ng)                                # == (1-z)*n + z*h

    out_ref[0] = h


def run_ggnn_layer(a_stack, h, inv_deg, gi_bias, w_big, b_hn, num_timesteps):
    b, n, d = h.shape
    e = a_stack.shape[1]
    kernel = functools.partial(ggnn_layer_kernel, num_timesteps=num_timesteps,
                               edge_types=e, hidden=d)
    return pl.pallas_call(
        kernel,
        out_shape=jax.ShapeDtypeStruct((b, n, d), jnp.float32),
        grid=(b,),
        in_specs=[
            pl.BlockSpec((1, e, n, n), lambda i: (i, 0, 0, 0)),      # per-graph adjacency
            pl.BlockSpec((1, n, d), lambda i: (i, 0, 0)),            # per-graph h0
            pl.BlockSpec((1, n, 1), lambda i: (i, 0, 0)),            # per-graph 1/in_degree
            pl.BlockSpec((1, n, 3 * d), lambda i: (i, 0, 0)),        # per-graph gi_bias
            pl.BlockSpec((d, (e + 1) * LANE), lambda i: (0, 0)),     # shared fused weights
            pl.BlockSpec((1, d), lambda i: (0, 0)),                  # shared b_hh n-chunk
        ],
        out_specs=pl.BlockSpec((1, n, d), lambda i: (i, 0, 0)),
        compiler_params=pltpu.CompilerParams(
            dimension_semantics=("parallel",)),                      # v7x: 2 TCs split batch
    )(a_stack, h, inv_deg, gi_bias, w_big, b_hn)


# ----------------- one-time preprocessing (hoisted out of the forward path) ------------
def preprocess_graph(edge_lists, num_nodes):
    """Build per-graph dense adjacency (exact integer counts) + mean-agg reciprocal.

    A_stack[e, t, s] = #edges s->t of effective edge type e.  Backward edges
    (edge_list.flip([1])) are appended, matching GGNNProper.forward.
    """
    n = num_nodes
    if USE_BACKWARD_EDGES:
        edge_lists = list(edge_lists) + [el[:, ::-1] for el in edge_lists]
    blocks = []
    for el in edge_lists:
        blocks.append(jnp.zeros((n, n), jnp.float32).at[el[:, 1], el[:, 0]].add(1.0))
    a_stack = jnp.stack(blocks, axis=0)                       # [E, N, N]
    if MSG_MEAN_AGG:
        deg = a_stack.sum(axis=(0, 2))                        # in-degree (== target bincount)
        deg = jnp.where(deg == 0.0, 1.0, deg)
        inv_deg = (1.0 / deg)[:, None]                        # [N, 1] f32
    else:
        inv_deg = jnp.ones((n, 1), jnp.float32)
    return a_stack, inv_deg


def prepare_layer(a_stack_b, inv_deg_b, p):
    """Fold W_ih into the message weights and every h-independent bias term (in f32)."""
    d = HIDDEN
    e = EDGE_TYPES
    # W_big = [ W_msg_0 @ W_ih | ... | W_msg_{E-1} @ W_ih | W_hh ], each padded to 128 lanes.
    w_big = jnp.zeros((d, (e + 1) * LANE), jnp.float32)
    for i in range(e):
        w_fused_i = p["w_msg"][:, i * d:(i + 1) * d] @ p["w_ih"]      # [D, 3D] f32 fold
        w_big = w_big.at[:, i * LANE:i * LANE + 3 * d].set(w_fused_i)
    w_big = w_big.at[:, e * LANE:e * LANE + 3 * d].set(p["w_hh"])
    w_big = w_big.astype(jnp.bfloat16)                                # cast ONCE here

    # gi_bias = inv_deg * sum_e rowsum(A_e) * (b_msg_e @ W_ih) + b_ih (+ b_hh for r,z)
    rowsum = a_stack_b.sum(axis=3)                                    # [B, E, N]
    bias_msg = p["b_msg"].reshape(e, d) @ p["w_ih"]                   # [E, 3D]
    bias_pre = jnp.einsum("ben,ek->bnk", rowsum, bias_msg)            # [B, N, 3D]
    gi_bias = inv_deg_b * bias_pre + p["b_ih"][None]                  # [B, N, 3D] f32
    gi_bias = gi_bias.at[:, :, :2 * d].add(p["b_hh"][:, :2 * d])
    b_hn = p["b_hh"][:, 2 * d:]                                       # [1, D] f32
    return {"w_big": w_big, "gi_bias": gi_bias, "b_hn": b_hn}


def prepare_inputs(edge_lists_per_graph, num_nodes, params_per_layer):
    a_list, inv_list = [], []
    for els in edge_lists_per_graph:
        a, inv = preprocess_graph(els, num_nodes)
        a_list.append(a)
        inv_list.append(inv)
    a_stack_b = jnp.stack(a_list, axis=0)                             # [B, E, N, N] f32 counts
    inv_deg_b = jnp.stack(inv_list, axis=0)                           # [B, N, 1]
    layers = [prepare_layer(a_stack_b, inv_deg_b, p) for p in params_per_layer]
    return a_stack_b.astype(jnp.bfloat16), inv_deg_b, layers          # counts exact in bf16


# ----------------- GGNNProper.forward (glue in plain JAX) -----------------
def ggnn_proper_forward(a_stack_b, inv_deg_b, node_states_b, prepared_layers):
    old_node_states = node_states_b                                   # .clone()
    h = node_states_b
    for layer_idx, num_timesteps in enumerate(LAYER_TIMESTEPS):
        pp = prepared_layers[layer_idx]
        h = run_ggnn_layer(a_stack_b, h, inv_deg_b,
                           pp["gi_bias"], pp["w_big"], pp["b_hn"], num_timesteps)
    return h, old_node_states


# ----------------- pure-JAX scatter/gather reference (PyTorch semantics, f32) ----------
def reference_forward(edge_lists_per_graph, node_states_b, params_per_layer):
    outs = []
    for g, edge_lists in enumerate(edge_lists_per_graph):
        h = node_states_b[g]
        n, d = h.shape
        els = list(edge_lists)
        if USE_BACKWARD_EDGES:
            els = els + [el[:, ::-1] for el in edge_lists]
        bincount = jnp.zeros((n,), jnp.int32)
        for el in els:
            bincount = bincount + jnp.bincount(el[:, 1], length=n).astype(jnp.int32)
        bincount = jnp.where(bincount == 0, 1, bincount)
        divisor = bincount.astype(jnp.float32)[:, None]

        for layer_idx, num_timesteps in enumerate(LAYER_TIMESTEPS):
            p = params_per_layer[layer_idx]
            for _ in range(num_timesteps):
                prop = h @ p["w_msg"] + p["b_msg"]                    # [N, E*D]
                msgs = jnp.zeros_like(h)
                for e, el in enumerate(els):
                    src, tgt = el[:, 0], el[:, 1]
                    msgs = msgs.at[tgt].add(prop[:, e * d:(e + 1) * d][src])
                if MSG_MEAN_AGG:
                    msgs = msgs / divisor
                gi = msgs @ p["w_ih"] + p["b_ih"]
                gh = h @ p["w_hh"] + p["b_hh"]
                r = jax.nn.sigmoid(gi[:, :d] + gh[:, :d])
                z = jax.nn.sigmoid(gi[:, d:2 * d] + gh[:, d:2 * d])
                nn_ = jnp.tanh(gi[:, 2 * d:] + r * gh[:, 2 * d:])
                h = (1.0 - z) * nn_ + z * h
        outs.append(h)
    return jnp.stack(outs, axis=0), node_states_b


# ----------------- deterministic parameter init -----------------
def init_params(key):
    params_per_layer = []
    for _ in LAYER_TIMESTEPS:
        key, k1, k2, k3, k4, k5 = jax.random.split(key, 6)
        scale = 1.0 / jnp.sqrt(jnp.float32(HIDDEN))
        params_per_layer.append({
            # MessagingLayer: LinearNet(D, E*D) weight [E*D, D] -> stored transposed [D, E*D]
            "w_msg": jax.random.normal(k1, (HIDDEN, EDGE_TYPES * HIDDEN), jnp.float32) * scale,
            "b_msg": jax.random.normal(k2, (1, EDGE_TYPES * HIDDEN), jnp.float32) * 0.01,
            # GGNNLayer: GRUCell weight_ih/hh [3D, D] -> stored transposed [D, 3D]
            "w_ih": jax.random.normal(k3, (HIDDEN, 3 * HIDDEN), jnp.float32) * scale,
            "w_hh": jax.random.normal(k4, (HIDDEN, 3 * HIDDEN), jnp.float32) * scale,
            "b_ih": jax.random.normal(k5, (1, 3 * HIDDEN), jnp.float32) * 0.01,
            "b_hh": jnp.zeros((1, 3 * HIDDEN), jnp.float32),
        })
    return params_per_layer


if __name__ == "__main__":
    key = jax.random.PRNGKey(0)
    key, k_h, k_e = jax.random.split(key, 3)

    node_states = jax.random.normal(k_h, (BATCH, N_NODES, HIDDEN), jnp.float32)
    graph_keys = jax.random.split(k_e, BATCH)
    edge_lists_per_graph = []
    for gk in graph_keys:
        edge_keys = jax.random.split(gk, FWD_EDGE_TYPES)
        edge_lists_per_graph.append([
            jax.random.randint(ek, (EDGES_PER_TYPE, 2), 0, N_NODES, dtype=jnp.int32)
            for ek in edge_keys
        ])
    params = init_params(key)

    # One-time graph/weight preprocessing (static structure) — outside the forward path.
    a_stack_b, inv_deg_b, layers = prepare_inputs(edge_lists_per_graph, N_NODES, params)
    a_stack_b = jax.block_until_ready(a_stack_b)

    fwd = jax.jit(ggnn_proper_forward)
    new_states, old_states = fwd(a_stack_b, inv_deg_b, node_states, layers)
    new_states = jax.block_until_ready(new_states)
    old_states = jax.block_until_ready(old_states)

    ref_new, ref_old = reference_forward(edge_lists_per_graph, node_states, params)
    assert new_states.shape == (BATCH, N_NODES, HIDDEN)
    assert jnp.allclose(old_states, node_states)
    # Tolerance accounts for bf16 MXU inputs / fused-weight rounding (f32 accumulation)
    # vs. the pure-f32 scatter/gather reference.
    max_err = float(jnp.max(jnp.abs(new_states - ref_new)))
    assert jnp.allclose(new_states, ref_new, atol=3e-2, rtol=3e-2), max_err

    print("KERNEL_OK")
</pallas_src>

<mosaic_0001>
module attributes {stable_mosaic.version = 11 : i64} {
  func.func @ggnn_layer_kernel(%arg0: i32, %arg1: memref<1x4x16x16xbf16, #tpu.memory_space<vmem>>, %arg2: memref<1x16x32xf32, #tpu.memory_space<vmem>>, %arg3: memref<1x16x1xf32, #tpu.memory_space<vmem>>, %arg4: memref<1x16x96xf32, #tpu.memory_space<vmem>>, %arg5: memref<32x640xbf16, #tpu.memory_space<vmem>>, %arg6: memref<1x32xf32, #tpu.memory_space<vmem>>, %arg7: memref<1x16x32xf32, #tpu.memory_space<vmem>>) attributes {dimension_semantics = [#tpu.dimension_semantics<parallel>], iteration_bounds = array<i64: 4>, scalar_prefetch = 0 : i64, scratch_operands = 0 : i64, tpu.core_type = #tpu.core_type<tc>, window_params = [{transform_indices = @transform_0, window_bounds = array<i64: 1, 4, 16, 16>}, {transform_indices = @transform_1, window_bounds = array<i64: 1, 16, 32>}, {transform_indices = @transform_2, window_bounds = array<i64: 1, 16, 1>}, {transform_indices = @transform_3, window_bounds = array<i64: 1, 16, 96>}, {pipeline_mode = #tpu.pipeline_mode<synchronous>, transform_indices = @transform_4, window_bounds = array<i64: 32, 640>}, {pipeline_mode = #tpu.pipeline_mode<synchronous>, transform_indices = @transform_5, window_bounds = array<i64: 1, 32>}, {transform_indices = @transform_6, window_bounds = array<i64: 1, 16, 32>}]} {
    %c0 = arith.constant 0 : index
    %c0_0 = arith.constant 0 : index
    %c0_1 = arith.constant 0 : index
    %c0_2 = arith.constant 0 : index
    %0 = vector.load %arg1[%c0, %c0_0, %c0_1, %c0_2] : memref<1x4x16x16xbf16, #tpu.memory_space<vmem>>, vector<1x4x16x16xbf16>
    %1 = vector.shape_cast %0 : vector<1x4x16x16xbf16> to vector<4x16x16xbf16>
    %c0_3 = arith.constant 0 : index
    %c0_4 = arith.constant 0 : index
    %2 = vector.load %arg5[%c0_3, %c0_4] : memref<32x640xbf16, #tpu.memory_space<vmem>>, vector<32x640xbf16>
    %c0_5 = arith.constant 0 : index
    %c0_6 = arith.constant 0 : index
    %c0_7 = arith.constant 0 : index
    %3 = vector.load %arg3[%c0_5, %c0_6, %c0_7] : memref<1x16x1xf32, #tpu.memory_space<vmem>>, vector<1x16x1xf32>
    %4 = vector.shape_cast %3 : vector<1x16x1xf32> to vector<16x1xf32>
    %c0_8 = arith.constant 0 : index
    %c0_9 = arith.constant 0 : index
    %c0_10 = arith.constant 0 : index
    %5 = vector.load %arg4[%c0_8, %c0_9, %c0_10] : memref<1x16x96xf32, #tpu.memory_space<vmem>>, vector<1x16x96xf32>
    %6 = vector.shape_cast %5 : vector<1x16x96xf32> to vector<16x96xf32>
    %c0_11 = arith.constant 0 : index
    %c0_12 = arith.constant 0 : index
    %7 = vector.load %arg6[%c0_11, %c0_12] : memref<1x32xf32, #tpu.memory_space<vmem>>, vector<1x32xf32>
    %8 = vector.shape_cast %7 : vector<1x32xf32> to vector<1x32xf32>
    %9 = vector.broadcast %8 : vector<1x32xf32> to vector<16x32xf32>
    %c0_13 = arith.constant 0 : index
    %c0_14 = arith.constant 0 : index
    %c0_15 = arith.constant 0 : index
    %10 = vector.load %arg2[%c0_13, %c0_14, %c0_15] : memref<1x16x32xf32, #tpu.memory_space<vmem>>, vector<1x16x32xf32>
    %11 = vector.shape_cast %10 : vector<1x16x32xf32> to vector<16x32xf32>
    %12 = arith.truncf %11 : vector<16x32xf32> to vector<16x32xbf16>
    %cst = arith.constant dense<0.000000e+00> : vector<16x640xf32>
    %13 = tpu.matmul %12, %2, %cst {dimension_numbers = #tpu.dot_dimension_numbers<[1], [0], [0], [1], [0, 0, 1, 1], [], []>} : vector<16x32xbf16>, vector<32x640xbf16>, vector<16x640xf32> -> vector<16x640xf32>
    %14 = vector.extract_strided_slice %1 {offsets = [0, 0, 0], sizes = [1, 16, 16], strides = [1, 1, 1]} : vector<4x16x16xbf16> to vector<1x16x16xbf16>
    %15 = vector.shape_cast %14 : vector<1x16x16xbf16> to vector<16x16xbf16>
    %16 = vector.extract_strided_slice %13 {offsets = [0, 0], sizes = [16, 128], strides = [1, 1]} : vector<16x640xf32> to vector<16x128xf32>
    %17 = arith.truncf %16 : vector<16x128xf32> to vector<16x128xbf16>
    %cst_16 = arith.constant dense<0.000000e+00> : vector<16x128xf32>
    %18 = tpu.matmul %15, %17, %cst_16 {dimension_numbers = #tpu.dot_dimension_numbers<[1], [0], [0], [1], [0, 0, 1, 1], [], []>} : vector<16x16xbf16>, vector<16x128xbf16>, vector<16x128xf32> -> vector<16x128xf32>
    %19 = vector.extract_strided_slice %1 {offsets = [1, 0, 0], sizes = [1, 16, 16], strides = [1, 1, 1]} : vector<4x16x16xbf16> to vector<1x16x16xbf16>
    %20 = vector.shape_cast %19 : vector<1x16x16xbf16> to vector<16x16xbf16>
    %21 = vector.extract_strided_slice %13 {offsets = [0, 128], sizes = [16, 128], strides = [1, 1]} : vector<16x640xf32> to vector<16x128xf32>
    %22 = arith.truncf %21 : vector<16x128xf32> to vector<16x128xbf16>
    %cst_17 = arith.constant dense<0.000000e+00> : vector<16x128xf32>
    %23 = tpu.matmul %20, %22, %cst_17 {dimension_numbers = #tpu.dot_dimension_numbers<[1], [0], [0], [1], [0, 0, 1, 1], [], []>} : vector<16x16xbf16>, vector<16x128xbf16>, vector<16x128xf32> -> vector<16x128xf32>
    %24 = arith.addf %18, %23 : vector<16x128xf32>
    %25 = vector.extract_strided_slice %1 {offsets = [2, 0, 0], sizes = [1, 16, 16], strides = [1, 1, 1]} : vector<4x16x16xbf16> to vector<1x16x16xbf16>
    %26 = vector.shape_cast %25 : vector<1x16x16xbf16> to vector<16x16xbf16>
    %27 = vector.extract_strided_slice %13 {offsets = [0, 256], sizes = [16, 128], strides = [1, 1]} : vector<16x640xf32> to vector<16x128xf32>
    %28 = arith.truncf %27 : vector<16x128xf32> to vector<16x128xbf16>
    %cst_18 = arith.constant dense<0.000000e+00> : vector<16x128xf32>
    %29 = tpu.matmul %26, %28, %cst_18 {dimension_numbers = #tpu.dot_dimension_numbers<[1], [0], [0], [1], [0, 0, 1, 1], [], []>} : vector<16x16xbf16>, vector<16x128xbf16>, vector<16x128xf32> -> vector<16x128xf32>
    %30 = arith.addf %24, %29 : vector<16x128xf32>
    %31 = vector.extract_strided_slice %1 {offsets = [3, 0, 0], sizes = [1, 16, 16], strides = [1, 1, 1]} : vector<4x16x16xbf16> to vector<1x16x16xbf16>
    %32 = vector.shape_cast %31 : vector<1x16x16xbf16> to vector<16x16xbf16>
    %33 = vector.extract_strided_slice %13 {offsets = [0, 384], sizes = [16, 128], strides = [1, 1]} : vector<16x640xf32> to vector<16x128xf32>
    %34 = arith.truncf %33 : vector<16x128xf32> to vector<16x128xbf16>
    %cst_19 = arith.constant dense<0.000000e+00> : vector<16x128xf32>
    %35 = tpu.matmul %32, %34, %cst_19 {dimension_numbers = #tpu.dot_dimension_numbers<[1], [0], [0], [1], [0, 0, 1, 1], [], []>} : vector<16x16xbf16>, vector<16x128xbf16>, vector<16x128xf32> -> vector<16x128xf32>
    %36 = arith.addf %30, %35 : vector<16x128xf32>
    %37 = vector.extract_strided_slice %36 {offsets = [0, 0], sizes = [16, 96], strides = [1, 1]} : vector<16x128xf32> to vector<16x96xf32>
    %38 = vector.broadcast %4 : vector<16x1xf32> to vector<16x96xf32>
    %39 = arith.mulf %38, %37 : vector<16x96xf32>
    %40 = arith.addf %39, %6 : vector<16x96xf32>
    %41 = vector.extract_strided_slice %13 {offsets = [0, 512], sizes = [16, 96], strides = [1, 1]} : vector<16x640xf32> to vector<16x96xf32>
    %42 = vector.extract_strided_slice %40 {offsets = [0, 0], sizes = [16, 64], strides = [1, 1]} : vector<16x96xf32> to vector<16x64xf32>
    %43 = vector.extract_strided_slice %41 {offsets = [0, 0], sizes = [16, 64], strides = [1, 1]} : vector<16x96xf32> to vector<16x64xf32>
    %44 = arith.addf %42, %43 : vector<16x64xf32>
    %45 = arith.negf %44 : vector<16x64xf32>
    %46 = math.exp %45 : vector<16x64xf32>
    %cst_20 = arith.constant 1.000000e+00 : f32
    %47 = vector.broadcast %cst_20 : f32 to vector<16x64xf32>
    %48 = arith.addf %47, %46 : vector<16x64xf32>
    %49 = arith.divf %47, %48 : vector<16x64xf32>
    %50 = vector.extract_strided_slice %49 {offsets = [0, 0], sizes = [16, 32], strides = [1, 1]} : vector<16x64xf32> to vector<16x32xf32>
    %51 = vector.extract_strided_slice %49 {offsets = [0, 32], sizes = [16, 32], strides = [1, 1]} : vector<16x64xf32> to vector<16x32xf32>
    %52 = vector.extract_strided_slice %40 {offsets = [0, 64], sizes = [16, 32], strides = [1, 1]} : vector<16x96xf32> to vector<16x32xf32>
    %53 = vector.extract_strided_slice %41 {offsets = [0, 64], sizes = [16, 32], strides = [1, 1]} : vector<16x96xf32> to vector<16x32xf32>
    %54 = arith.addf %53, %9 : vector<16x32xf32>
    %55 = arith.mulf %50, %54 : vector<16x32xf32>
    %56 = arith.addf %52, %55 : vector<16x32xf32>
    %57 = math.tanh %56 : vector<16x32xf32>
    %58 = arith.subf %11, %57 : vector<16x32xf32>
    %59 = arith.mulf %51, %58 : vector<16x32xf32>
    %60 = arith.addf %57, %59 : vector<16x32xf32>
    %61 = arith.truncf %60 : vector<16x32xf32> to vector<16x32xbf16>
    %cst_21 = arith.constant dense<0.000000e+00> : vector<16x640xf32>
    %62 = tpu.matmul %61, %2, %cst_21 {dimension_numbers = #tpu.dot_dimension_numbers<[1], [0], [0], [1], [0, 0, 1, 1], [], []>} : vector<16x32xbf16>, vector<32x640xbf16>, vector<16x640xf32> -> vector<16x640xf32>
    %63 = vector.extract_strided_slice %1 {offsets = [0, 0, 0], sizes = [1, 16, 16], strides = [1, 1, 1]} : vector<4x16x16xbf16> to vector<1x16x16xbf16>
    %64 = vector.shape_cast %63 : vector<1x16x16xbf16> to vector<16x16xbf16>
    %65 = vector.extract_strided_slice %62 {offsets = [0, 0], sizes = [16, 128], strides = [1, 1]} : vector<16x640xf32> to vector<16x128xf32>
    %66 = arith.truncf %65 : vector<16x128xf32> to vector<16x128xbf16>
    %cst_22 = arith.constant dense<0.000000e+00> : vector<16x128xf32>
    %67 = tpu.matmul %64, %66, %cst_22 {dimension_numbers = #tpu.dot_dimension_numbers<[1], [0], [0], [1], [0, 0, 1, 1], [], []>} : vector<16x16xbf16>, vector<16x128xbf16>, vector<16x128xf32> -> vector<16x128xf32>
    %68 = vector.extract_strided_slice %1 {offsets = [1, 0, 0], sizes = [1, 16, 16], strides = [1, 1, 1]} : vector<4x16x16xbf16> to vector<1x16x16xbf16>
    %69 = vector.shape_cast %68 : vector<1x16x16xbf16> to vector<16x16xbf16>
    %70 = vector.extract_strided_slice %62 {offsets = [0, 128], sizes = [16, 128], strides = [1, 1]} : vector<16x640xf32> to vector<16x128xf32>
    %71 = arith.truncf %70 : vector<16x128xf32> to vector<16x128xbf16>
    %cst_23 = arith.constant dense<0.000000e+00> : vector<16x128xf32>
    %72 = tpu.matmul %69, %71, %cst_23 {dimension_numbers = #tpu.dot_dimension_numbers<[1], [0], [0], [1], [0, 0, 1, 1], [], []>} : vector<16x16xbf16>, vector<16x128xbf16>, vector<16x128xf32> -> vector<16x128xf32>
    %73 = arith.addf %67, %72 : vector<16x128xf32>
    %74 = vector.extract_strided_slice %1 {offsets = [2, 0, 0], sizes = [1, 16, 16], strides = [1, 1, 1]} : vector<4x16x16xbf16> to vector<1x16x16xbf16>
    %75 = vector.shape_cast %74 : vector<1x16x16xbf16> to vector<16x16xbf16>
    %76 = vector.extract_strided_slice %62 {offsets = [0, 256], sizes = [16, 128], strides = [1, 1]} : vector<16x640xf32> to vector<16x128xf32>
    %77 = arith.truncf %76 : vector<16x128xf32> to vector<16x128xbf16>
    %cst_24 = arith.constant dense<0.000000e+00> : vector<16x128xf32>
    %78 = tpu.matmul %75, %77, %cst_24 {dimension_numbers = #tpu.dot_dimension_numbers<[1], [0], [0], [1], [0, 0, 1, 1], [], []>} : vector<16x16xbf16>, vector<16x128xbf16>, vector<16x128xf32> -> vector<16x128xf32>
    %79 = arith.addf %73, %78 : vector<16x128xf32>
    %80 = vector.extract_strided_slice %1 {offsets = [3, 0, 0], sizes = [1, 16, 16], strides = [1, 1, 1]} : vector<4x16x16xbf16> to vector<1x16x16xbf16>
    %81 = vector.shape_cast %80 : vector<1x16x16xbf16> to vector<16x16xbf16>
    %82 = vector.extract_strided_slice %62 {offsets = [0, 384], sizes = [16, 128], strides = [1, 1]} : vector<16x640xf32> to vector<16x128xf32>
    %83 = arith.truncf %82 : vector<16x128xf32> to vector<16x128xbf16>
    %cst_25 = arith.constant dense<0.000000e+00> : vector<16x128xf32>
    %84 = tpu.matmul %81, %83, %cst_25 {dimension_numbers = #tpu.dot_dimension_numbers<[1], [0], [0], [1], [0, 0, 1, 1], [], []>} : vector<16x16xbf16>, vector<16x128xbf16>, vector<16x128xf32> -> vector<16x128xf32>
    %85 = arith.addf %79, %84 : vector<16x128xf32>
    %86 = vector.extract_strided_slice %85 {offsets = [0, 0], sizes = [16, 96], strides = [1, 1]} : vector<16x128xf32> to vector<16x96xf32>
    %87 = vector.broadcast %4 : vector<16x1xf32> to vector<16x96xf32>
    %88 = arith.mulf %87, %86 : vector<16x96xf32>
    %89 = arith.addf %88, %6 : vector<16x96xf32>
    %90 = vector.extract_strided_slice %62 {offsets = [0, 512], sizes = [16, 96], strides = [1, 1]} : vector<16x640xf32> to vector<16x96xf32>
    %91 = vector.extract_strided_slice %89 {offsets = [0, 0], sizes = [16, 64], strides = [1, 1]} : vector<16x96xf32> to vector<16x64xf32>
    %92 = vector.extract_strided_slice %90 {offsets = [0, 0], sizes = [16, 64], strides = [1, 1]} : vector<16x96xf32> to vector<16x64xf32>
    %93 = arith.addf %91, %92 : vector<16x64xf32>
    %94 = arith.negf %93 : vector<16x64xf32>
    %95 = math.exp %94 : vector<16x64xf32>
    %cst_26 = arith.constant 1.000000e+00 : f32
    %96 = vector.broadcast %cst_26 : f32 to vector<16x64xf32>
    %97 = arith.addf %96, %95 : vector<16x64xf32>
    %98 = arith.divf %96, %97 : vector<16x64xf32>
    %99 = vector.extract_strided_slice %98 {offsets = [0, 0], sizes = [16, 32], strides = [1, 1]} : vector<16x64xf32> to vector<16x32xf32>
    %100 = vector.extract_strided_slice %98 {offsets = [0, 32], sizes = [16, 32], strides = [1, 1]} : vector<16x64xf32> to vector<16x32xf32>
    %101 = vector.extract_strided_slice %89 {offsets = [0, 64], sizes = [16, 32], strides = [1, 1]} : vector<16x96xf32> to vector<16x32xf32>
    %102 = vector.extract_strided_slice %90 {offsets = [0, 64], sizes = [16, 32], strides = [1, 1]} : vector<16x96xf32> to vector<16x32xf32>
    %103 = arith.addf %102, %9 : vector<16x32xf32>
    %104 = arith.mulf %99, %103 : vector<16x32xf32>
    %105 = arith.addf %101, %104 : vector<16x32xf32>
    %106 = math.tanh %105 : vector<16x32xf32>
    %107 = arith.subf %60, %106 : vector<16x32xf32>
    %108 = arith.mulf %100, %107 : vector<16x32xf32>
    %109 = arith.addf %106, %108 : vector<16x32xf32>
    %c0_27 = arith.constant 0 : index
    %c0_28 = arith.constant 0 : index
    %c0_29 = arith.constant 0 : index
    %110 = vector.load %arg7[%c0_27, %c0_28, %c0_29] : memref<1x16x32xf32, #tpu.memory_space<vmem>>, vector<1x16x32xf32>
    %111 = vector.shape_cast %110 : vector<1x16x32xf32> to vector<16x32xf32>
    %112 = vector.shape_cast %109 : vector<16x32xf32> to vector<1x16x32xf32>
    tpu.vector_store %arg7[%c0_27, %c0_28, %c0_29], %112 {strides = array<i32>} : memref<1x16x32xf32, #tpu.memory_space<vmem>>, vector<1x16x32xf32>,
    return
  }
  func.func @transform_0(%arg0: i32) -> (i32, i32, i32, i32) {
    %c0_i32 = arith.constant 0 : i32
    %c0_i32_0 = arith.constant 0 : i32
    %c0_i32_1 = arith.constant 0 : i32
    %c0_i32_2 = arith.constant 0 : i32
    return %arg0, %c0_i32, %c0_i32_0, %c0_i32_1 : i32, i32, i32, i32
  }
  func.func @transform_1(%arg0: i32) -> (i32, i32, i32) {
    %c0_i32 = arith.constant 0 : i32
    %c0_i32_0 = arith.constant 0 : i32
    %c0_i32_1 = arith.constant 0 : i32
    return %arg0, %c0_i32, %c0_i32_0 : i32, i32, i32
  }
  func.func @transform_2(%arg0: i32) -> (i32, i32, i32) {
    %c0_i32 = arith.constant 0 : i32
    %c0_i32_0 = arith.constant 0 : i32
    %c0_i32_1 = arith.constant 0 : i32
    return %arg0, %c0_i32, %c0_i32_0 : i32, i32, i32
  }
  func.func @transform_3(%arg0: i32) -> (i32, i32, i32) {
    %c0_i32 = arith.constant 0 : i32
    %c0_i32_0 = arith.constant 0 : i32
    %c0_i32_1 = arith.constant 0 : i32
    return %arg0, %c0_i32, %c0_i32_0 : i32, i32, i32
  }
  func.func @transform_4(%arg0: i32) -> (i32, i32) {
    %c0_i32 = arith.constant 0 : i32
    %c0_i32_0 = arith.constant 0 : i32
    %c0_i32_1 = arith.constant 0 : i32
    return %c0_i32, %c0_i32_0 : i32, i32
  }
  func.func @transform_5(%arg0: i32) -> (i32, i32) {
    %c0_i32 = arith.constant 0 : i32
    %c0_i32_0 = arith.constant 0 : i32
    %c0_i32_1 = arith.constant 0 : i32
    return %c0_i32, %c0_i32_0 : i32, i32
  }
  func.func @transform_6(%arg0: i32) -> (i32, i32, i32) {
    %c0_i32 = arith.constant 0 : i32
    %c0_i32_0 = arith.constant 0 : i32
    %c0_i32_1 = arith.constant 0 : i32
    return %arg0, %c0_i32, %c0_i32_0 : i32, i32, i32
  }
}

</mosaic_0001>

<bundles_post_ra>
// kernel: ggnn_proper_forward.1
= control target key start
LH: loop header
LB: loop body
LE: loop exit
PB: predicated region body
PF: predicated region fallthrough
CT: control target
= control target key end

     0   :  { %s1875_s0 = inlined_call_operand.hbm [shape: bf16[4,4,16,16], index: 0, kind: input, shape index: {}]   ;;  %s1876_s1 = inlined_call_operand.vmem [shape: f32[4,16,32], index: 1, kind: input, shape index: {}]   ;;  %s1877_s2 = inlined_call_operand.vmem [shape: f32[4,16,1], index: 2, kind: input, shape index: {}]   ;;  %s1878_s3 = inlined_call_operand.hbm [shape: f32[4,16,96], index: 3, kind: input, shape index: {}]   ;;  %s1879_s4 = inlined_call_operand.hbm [shape: bf16[32,640], index: 4, kind: input, shape index: {}]   ;;  %s1880_s5 = inlined_call_operand.vmem [shape: f32[1,32], index: 5, kind: input, shape index: {}]   ;;  %s1881_s6 = inlined_call_operand.hbm [shape: f32[4,16,32], index: 6, kind: output, shape index: {}]  }
   0x1   :  { %1886 = sst [smem:[#allocation17_spill]] %s1875_s0 }
   0x2   :  { %1887 = sst [smem:[#allocation18_spill]] %s1879_s4 }
   0x3   :  { %11 = vsyncpa [#allocation3], 0 }
   0x4   :  { %13 = vsyncpa [#allocation3 + $0x1], 0 }
   0x5   :  { %14 = vsyncpa [#allocation6], 0 }
   0x6   :  { %16 = vsyncpa [#allocation6 + $0x1], 0 }
   0x7   :  { %17 = vsyncpa [#allocation4], 0 }
   0x8   :  { %19 = vsyncpa [#allocation4 + $0x1], 0  ;;  %s1557_s21 = smov 0   ;;  %s1559_s22 = smov 0  }
   0x9   :  { %s1561_s23 = smov 0   ;;  %s1563_s24 = smov 0  }
   0xa LB: > { %1888 = sst [smem:[#allocation13_spill]] %s1503_s23  ;;  %s1578_s25 = sadd.s32 4294967295, %s1507_s24   ;;  %s1507_s24 = sphi %s1563_s24, %s1900_s24   ;;  %s1503_s23 = sphi %s1561_s23, %s1905_s23   ;;  %s1499_s22 = sphi %s1559_s22, %s1904_s22   ;;  %s1495_s21 = sphi %s1557_s21, %s1903_s21  }
   0xb   : > { %s1121_s26 = sadd.s32 4294967294, %s1507_s24   ;;  %p45_p0 = scmp.ne.s32.totalorder %s1499_s22, %s1495_s21 }
   0xc   : > { %p46_p1 = scmp.eq.s32.totalorder %s1578_s25, 0  ;;  %p189_p2 = scmp.eq.s32.totalorder %s1578_s25, 3 }
   0xd   : > { %p195_p3 = scmp.eq.s32.totalorder %s1121_s26, 3  ;;  %p1122_p5 = scmp.ge.s32.totalorder %s1507_s24, 1 }
   0xe   : > { %p1587_p4 = por %p46_p1, %p45_p0  ;;  %p202_p7 = scmp.lt.s32.totalorder %s1507_s24, 5 }
   0xf   : > { %p1592_p6 = por %p195_p3, %p45_p0  ;;  %s1892_s4 = sld [smem:[#allocation18_spill]] }
  0x10   : > { %p1600_p8 = pnand %p1122_p5, %p202_p7  ;;  %s1509_s9 = smov [#allocation7]  }
  0x11   : > { %s1890_s28 = scalar_select %p1592_p6, 1, 0 }
  0x12   : > { %p1252_p9 = pneg %p1600_p8  ;;  %s215_s10 = sshll.u32 %s1509_s9, 4  ;;  %s216_s10 = int_to_ptr.vmem [resolvable:$true] %s215_s10 }
  0x13   : > { %1891 = sst [smem:[#allocation14_spill]] %s1890_s28  ;;  %s1609_s11 = sadd.s32 1, %s1507_s24  }
  0x14   : > { %p1253_p10 = pnand %p1252_p9, %p46_p1  ;;  %1894 = sst [smem:[#allocation15_spill]] %s1609_s11 }
  0x15   : > { %s213_s7 = sshll.u32 %s1892_s4, 4  ;;  %s1510_s12 = smov 320   ;;  %s214_s7 = int_to_ptr.hbm [resolvable:$true] %s213_s7 }
  0x16   : > { %s1511_s13 = smov 20   ;;  %s29_s14 = ssub.s32 %s1507_s24, %s1609_s11 }
  0x17   : > { %1255 = dma.hbm_to_vmem [thread:$0]  (!%p1253_p10), %s214_s7, 1280, %s216_s10, [#allocation6], %s1510_s12, %s1510_s12, %s1511_s13  }
  0x18   : > { %s32_s15 = sadd.s32 1, %s1503_s23  ;;  %p30_p11 = scmp.eq.s32.totalorder %s29_s14, 0 }
  0x19   : > { %p39_p12 = scmp.ne.s32.totalorder %s1503_s23, %s1499_s22  ;;  %p40_p13 = scmp.eq.s32.totalorder %s1507_s24, 0 }
  0x1a   : > { %p1268_p0 = scmp.lt.s32.totalorder %s1507_s24, 4  ;;  %s1628_s18 = sand.u32 1, %s1503_s23  }
  0x1b   : > { %s1619_s16 = scalar_select %p30_p11, %s1503_s23, %s32_s15  }
  0x1c   : > { %p41_p3 = por %p40_p13, %p39_p12  ;;  %p1623_p5 = por %p189_p2, %p39_p12 }
  0x1d   : > { %1895 = sst [smem:[#allocation16_spill]] %s1619_s16  ;;  %s1223_s19 = sshll.u32 %s1507_s24, 5 }
  0x1e   : > { %s1125_s20 = sshll.u32 %s1628_s18, 5  ;;  %s1897_s0 = sld [smem:[#allocation17_spill]] }
  0x1f   : > { %s236_s9 = scalar_lea.vmem [#allocation2], %s1125_s20  ;;  %p1637_p2 = pnand %p1268_p0, %p41_p3 }
  0x20   : > { %s244_s10 = sshll.u32 %s236_s9, 4  ;;  %s270_s13 = sand.u32 1, %s1507_s24   ;;  %s245_s10 = int_to_ptr.vmem [resolvable:$true] %s244_s10 }
  0x21   : > { %s233_s14 = scalar_lea.sflag [#allocation3], %s1628_s18  ;;  %p1377_p9 = pneg %p1637_p2 }
  0x24   : > { %s241_s30 = scalar_lea.hbm %s1897_s0, %s1223_s19  ;;  %s1380_s26 = scalar_lea.hbm %s1897_s0, 128 }
  0x25   : > { %s242_s7 = sshll.u32 %s241_s30, 4  ;;  %s243_s7 = int_to_ptr.hbm [resolvable:$true] %s242_s7 }
  0x26   : > { %s1373_s15 = sshra.s32 %s243_s7, 4  ;;  %s1374_s15 = int_to_ptr.hbm [resolvable:$true] %s1373_s15 }
  0x27   : > { %s1375_s4 = scalar_lea.hbm %s1374_s15, 32  ;;  %p1381_p12 = scmp.lt.s32.totalorder %s1374_s15, %s1897_s0 }
  0x28   : > { %p1376_p7 = scmp.ne.s32.totalorder %s1374_s15, %s1375_s4  ;;  %p1382_p13 = scmp.lt.s32.totalorder %s1380_s26, %s1375_s4 }
  0x2a   : > { %p1378_p10 = pnand %p1377_p9, %p1376_p7  ;;  %p1383_p0 = por %p1382_p13, %p1381_p12 }
  0x2c   : > { %p1379_p11 = pneg %p1378_p10 }
  0x2e   : > { %p1384_p3 = pnand %p1383_p0, %p1379_p11 }
  0x30   : > { %1387 = shalt.err (!%p1384_p3)
}
  0x31   : > { %s1512_s9 = smov 64   ;;  %s1513_s16 = smov 4  }
  0x32   : > { %1259 = dma.hbm_to_vmem [thread:$0]  (!%p1637_p2), %s243_s7, 512, %s245_s10, %s233_s14, %s1512_s9, %s1512_s9, %s1513_s16  }
  0x33   : > { %s1128_s23 = sshll.u32 %s1628_s18, 4  ;;  %s1224_s11 = sshll.u32 %s1507_s24, 4 }
  0x34   : > { %s279_s28 = scalar_lea.hbm %s1878_s3, %s1224_s11  ;;  %s274_s15 = scalar_lea.vmem [#allocation5], %s1128_s23 }
  0x35   : > { %s280_s29 = sshll.u32 %s279_s28, 4  ;;  %s282_s4 = sshll.u32 %s274_s15, 4  ;;  %s281_s29 = int_to_ptr.hbm [resolvable:$true] %s280_s29  ;;  %s283_s4 = int_to_ptr.vmem [resolvable:$true] %s282_s4 }
  0x36   : > { %s271_s26 = scalar_lea.sflag [#allocation6], %s270_s13  ;;  %s1403_s30 = sshra.s32 %s281_s29, 4  ;;  %s1404_s30 = int_to_ptr.hbm [resolvable:$true] %s1403_s30 }
  0x37   : > { %s1405_s0 = scalar_lea.hbm %s1404_s30, 16  ;;  %s1410_s7 = scalar_lea.hbm %s1878_s3, 64 }
  0x38   : > { %p1406_p7 = scmp.ne.s32.totalorder %s1404_s30, %s1405_s0  ;;  %p1411_p12 = scmp.lt.s32.totalorder %s1404_s30, %s1878_s3 }
  0x39   : > { %p1412_p13 = scmp.lt.s32.totalorder %s1410_s7, %s1405_s0 }
  0x3a   : > { %p1408_p10 = pnand %p1406_p7, %p1377_p9 }
  0x3b   : > { %p1413_p0 = por %p1412_p13, %p1411_p12 }
  0x3c   : > { %p1409_p11 = pneg %p1408_p10 }
  0x3e   : > { %p1414_p3 = pnand %p1413_p0, %p1409_p11 }
  0x40   : > { %1417 = shalt.err (!%p1414_p3)
}
  0x41   : > { %s1514_s23 = smov 128   ;;  %s1515_s28 = smov 8  }
  0x42   : > { %1262 = dma.hbm_to_vmem [thread:$0]  (!%p1637_p2), %s281_s29, 256, %s283_s4, %s271_s26, %s1514_s23, %s1514_s23, %s1515_s28  }
  0x43   : > { %294 = sbr.rel (%p1600_p8) target bundleno = 1740 (0x6cc), region = 44  ;;  %s1675_s13 = sand.u32 (!%p1600_p8), 1, %s1499_s22  }
  0x44   : > { %s1132_s14 = sshll.u32 (!%p1600_p8), %s1675_s13, 5  ;;  %s297_s9 = scalar_lea.sflag (!%p1600_p8), [#allocation3], %s1675_s13 }
  0x45   : > { %s1679_s0 = scalar_lea.vmem (!%p1600_p8), [#allocation2], %s1132_s14 }
  0x48   : > { %1478 = dma.done.wait (%p1587_p4), %s297_s9, 512  }
  0x49   : > { %1480 = vsyncadd (%p1587_p4), %s297_s9, 4294966784  ;;  %s306_s8 = sand.u32 1, %s1578_s25   ;;  %s1133_s12 = sshll.u32 %s1675_s13, 4 }
  0x4a   : > { %s307_s19 = scalar_lea.sflag [#allocation6], %s306_s8  ;;  %s1689_s20 = scalar_lea.vmem [#allocation5], %s1133_s12 }
  0x4b   : > { %1482 = dma.done.wait (%p1587_p4), %s307_s19, 256  }
  0x4c   : > { %1484 = vsyncadd (%p1587_p4), %s307_s19, 4294967040 }
  0x4d   : > { %1486 = dma.done.wait (%p46_p1), [#allocation6], 1280  }
  0x4e   : > { %1488 = vsyncadd (%p46_p1), [#allocation6], 4294966016  ;;  %p360_p8 = scmp.lt.s32.totalorder %s1578_s25, 3  ;;  %v1162_v0 = vld [vmem:[#allocation7 + $0x28] sm:$0xf]  ;;  %vm453_vm0 = vcmask 261120  }
  0x4f   : > { %v1238_v1 = vld [vmem:[#allocation7 + $0x38] sm:$0xf0]  ;;  %v1170_v2 = vld [vmem:[#allocation7 + $0x30] sm:$0xf]  ;;  %v1239_v4 = vld [vmem:[#allocation7 + $0x40] sm:$0xf0] }
  0x50   : > { %s1701_s29 = scalar_select %p360_p8, %s1578_s25, 3  ;;  %v1704_v3 = vor.u32 %v1238_v1, %v1162_v0  ;;  %v1237_v5 = vld [vmem:[#allocation7 + $0x34] sm:$0xf]  ;;  %v1172_v6 = vld [vmem:[#allocation7 + $0x44] sm:$0xf0]  ;;  %v1706_v7 = vor.u32 %v1239_v4, %v1170_v2  ;;  %v1517_v36 = vmov 0  }
  0x51   : > { %v1708_v8 = vor.u32 %v1237_v5, %v1172_v6  ;;  %v1236_v9 = vld [vmem:[#allocation7 + $0x2c] sm:$0xf]  ;;  %v1164_v10 = vld [vmem:[#allocation7 + $0x3c] sm:$0xf0]  ;;  %v1233_v13 = vld [vmem:[#allocation7 + $0x10] sm:$0xf0]  ;;  %1316 = vset.pattern.permute.xlu0 %v1517_v36  ;;  %1317 = vset.pattern.permute.xlu1 %v1517_v36 }
  0x52   : > { %s1225_s15 = sshll.u32 %s1701_s29, 4  ;;  %v1142_v11 = vld [vmem:[#allocation7] sm:$0xf]  ;;  %463 = vmatpush.bf16.msra.mxu0 %v1704_v3  ;;  %v1167_v12 = vor.u32 %v1236_v9, %v1164_v10  ;;  %v1150_v14 = vld [vmem:[#allocation7 + $0x8] sm:$0xf]  ;;  %491 = vmatpush.bf16.msra.mxu2 %v1706_v7  ;;  %s1516_s18 = smov 64  }
  0x53   : > { %s364_s26 = scalar_lea.vmem %s1876_s1, %s1225_s15  ;;  %v1234_v15 = vld [vmem:[#allocation7 + $0x18] sm:$0xf0]  ;;  %505 = vmatpush.bf16.msra.mxu3 %v1708_v8  ;;  %v1718_v16 = vor.u32 %v1233_v13, %v1142_v11  ;;  %v1232_v18 = vld [vmem:[#allocation7 + $0xc] sm:$0xf]  ;;  %v1152_v19 = vld [vmem:[#allocation7 + $0x1c] sm:$0xf0]  ;;  %s369_s11 = scalar_lea.vmem %s1877_s2, %s1225_s15 }
  0x54   : > { %v1720_v17 = vor.u32 %v1234_v15, %v1150_v14  ;;  %v1231_v20 = vld [vmem:[#allocation7 + $0x4] sm:$0xf]  ;;  %477 = vmatpush.bf16.msra.mxu1 %v1167_v12  ;;  %v1722_v21 = vor.u32 %v1232_v18, %v1152_v19  ;;  %v1144_v22 = vld [vmem:[#allocation7 + $0x14] sm:$0xf0]  ;;  %v1726_v24 = vld [vmem:[%s364_s26 + $0x8] sm:$0xff]  ;;  %vm534_vm1 = vcmask 130048  }
  0x55   : > { %v1724_v23 = vld [vmem:[%s364_s26] sm:$0xff]  ;;  %v1147_v25 = vor.u32 %v1231_v20, %v1144_v22  ;;  %v1178_v27 = vld [vmem:[#allocation7 + $0x38] sm:$0xf]  ;;  %v1240_v28 = vld [vmem:[#allocation7 + $0x48] sm:$0xf0]  ;;  %s1518_s23 = smov 32  }
  0x56   : > { %v400_v26 = vpack.c.bf16 %v1726_v24, %v1724_v23  ;;  %v1158_v29 = vld [vmem:[#allocation7 + $0x10] sm:$0xf]  ;;  %464 = vmatpush.bf16.msra.mxu0 %v1718_v16  ;;  %v1179_v30 = vor.u32 %v1240_v28, %v1178_v27  ;;  %v1235_v31 = vld [vmem:[#allocation7 + $0x20] sm:$0xf0]  ;;  %v1318_v32 = vld [vmem:[%s1880_s5] ss:$0 sm:$0xff]  ;;  %492 = vmatpush.bf16.msra.mxu2 %v1720_v17 }
  0x57   : > { %506 = vmatpush.bf16.msra.mxu3 %v1722_v21  ;;  %v1159_v33 = vor.u32 %v1235_v31, %v1158_v29  ;;  %678 = vrot.lane.b32.xlu0 %v1318_v32, %s1516_s18  ;;  %v391_v34 = vld [vmem:[%s369_s11] sm:$0xff]  ;;  %v392_v35 = vld [vmem:[%s369_s11 + $0x8] sm:$0xff]  ;;  %v1761_v53 = vld [vmem:[%s1679_s0 + $0x10] sm:$0xff]  ;;  %s1519_s28 = smov 96   ;;  %s359_s14 = scalar_lea.vmem [#allocation8], %s1133_s12 }
  0x58   : > { %478 = vmatpush.bf16.msra.mxu1 %v1147_v25  ;;  %631 = vperm.xlu1 %1317, %v392_v35   ;;  %v1748_v44 = vld [vmem:[%s1679_s0] sm:$0xff]  ;;  %v1751_v46 = vld [vmem:[%s1679_s0 + $0x8] sm:$0xff]  ;;  %v1764_v54 = vld [vmem:[%s1679_s0 + $0x18] sm:$0xff]  ;;  %s1241_s9 = sshll.u32 %s1578_s25, 4  ;;  %s977_s15 = scalar_lea.sflag [#allocation4], %s1675_s13 }
  0x59   : > { %1180 = vmatmul.msk.bf16.vlgmr.msra.gmra.mxu0 %vm453_vm0, %v400_v26  ;;  %1182 = vmatmul.msk.bf16.vlgmr.msra.gmra.mxu2 %vm453_vm0, %v400_v26  ;;  %v1789_v15 = vld [vmem:[%s1689_s20 + $0x8] sm:$0xff]  ;;  %s988_s19 = scalar_lea.hbm %s1881_s6, %s1241_s9  ;;  %s1453_s26 = scalar_lea.hbm %s1881_s6, 64 }
  0x5a   : > { %519 = vmatpush.bf16.msrb.mxu0 %v1179_v30  ;;  %1183 = vmatmul.msk.bf16.vlgmr.msra.gmra.mxu3 %vm453_vm0, %v400_v26  ;;  %s991_s29 = sshll.u32 %s988_s19, 4  ;;  %s992_s29 = int_to_ptr.hbm [resolvable:$true] %s991_s29 }
  0x5b   : > { %1181 = vmatmul.msk.bf16.vlgmr.msra.gmra.mxu1 %vm453_vm0, %v400_v26  ;;  %s1447_s27 = sshra.s32 %s992_s29, 4  ;;  %s1448_s27 = int_to_ptr.hbm [resolvable:$true] %s1447_s27 }
  0x5c   : > { %s1449_s4 = scalar_lea.hbm %s1448_s27, 16  ;;  %p1454_p9 = scmp.lt.s32.totalorder %s1448_s27, %s1881_s6 }
  0x5d   : > { %p1450_p1 = scmp.ne.s32.totalorder %s1448_s27, %s1449_s4  ;;  %p1455_p7 = scmp.lt.s32.totalorder %s1453_s26, %s1449_s4 }
  0x5e   : > { %520 = vmatpush.bf16.msrb.mxu0 %v1159_v33 }
  0x5f   : > { %626 = vperm.xlu0 %1316, %v391_v34   ;;  %p1451_p4 = pnand %p1450_p1, %p1623_p5  ;;  %p1456_p10 = por %p1455_p7, %p1454_p9 }
  0x61   : > { %p1452_p2 = pneg %p1451_p4 }
  0x63   : > { %p1457_p11 = pnand %p1456_p10, %p1452_p2 }
  0x69   : > { %1184 = vmatmul.msk.bf16.vlgmr.msrb.gmra.mxu0 %vm453_vm0, %v400_v26 }
  0xc9   : > { %v1755_v47 = vpop.permute.xlu0 %678 }
  0xd1   : > { %v1779_v0 = vpop.permute.xlu0 %626 }
  0xd6   : > { %v466_v37 = vpop.f32.mrf.mxu0 }
  0xd8   : > { %v480_v38 = vpop.f32.mrf.mxu1 }
  0xdc   : > { %v494_v39 = vpop.f32.mrf.mxu2 }
  0xdd   : > { %v508_v40 = vpop.f32.mrf.mxu3 }
  0xde   : > { %v468_v41 = vpop.f32.mrf.mxu0 }
  0xdf   : > { %v527_v42 = vpack.c.bf16 %v468_v41, %v466_v37 }
  0xe0   : > { %v482_v43 = vpop.f32.mrf.mxu1 }
  0xe1   : > { %v528_v45 = vpack.c.bf16 %v482_v43, %v480_v38  ;;  %567 = vmatpush.bf16.msrb.mxu2 %v527_v42 }
  0xe3   : > { %545 = vmatpush.bf16.msrb.mxu1 %v528_v45 }
  0xe4   : > { %1194 = vmatmul.msk.bf16.vlgmr.msrb.gmra.mxu2 %vm534_vm1, %v1748_v44  ;;  %v496_v48 = vpop.f32.mrf.mxu2 }
  0xe5   : > { %762 = vmatpush.bf16.msra.mxu2 %v1167_v12  ;;  %v510_v49 = vpop.f32.mrf.mxu3  ;;  %v574_v50 = vpack.c.bf16 %v496_v48, %v494_v39  ;;  %v1786_v12 = vpop.permute.xlu1 %631 }
  0xe6   : > { %v599_v51 = vpack.c.bf16 %v510_v49, %v508_v40  ;;  %1189 = vmatmul.msk.bf16.vlgmr.msrb.gmra.mxu1 %vm534_vm1, %v1751_v46  ;;  %v522_v52 = vpop.f32.mrf.mxu0 }
  0xe7   : > { %748 = vmatpush.bf16.msra.mxu1 %v1704_v3  ;;  %v681_v55 = vadd.f32 %v1755_v47, %v522_v52  ;;  %590 = vmatpush.bf16.msrb.mxu3 %v574_v50  ;;  %v1782_v3 = vld [vmem:[%s1689_s20] sm:$0xff]  ;;  %s989_s20 = sshll.u32 %s359_s14, 4  ;;  %s990_s20 = int_to_ptr.vmem [resolvable:$true] %s989_s20 }
  0xe8   : > { %615 = vmatpush.bf16.msra.mxu0 %v599_v51 }
  0xe9   : > { %763 = vmatpush.bf16.msra.mxu2 %v1147_v25  ;;  %685 = vrot.lane.b32.xlu1 %v681_v55, %s1516_s18 }
  0xea   : > { %1199 = vmatmul.msk.bf16.vlgmr.msrb.gmra.mxu3 %vm534_vm1, %v1761_v53 }
  0xeb   : > { %776 = vmatpush.bf16.msra.mxu3 %v1706_v7  ;;  %749 = vmatpush.bf16.msra.mxu1 %v1718_v16 }
  0xec   : > { %790 = vmatpush.bf16.msrb.mxu0 %v1708_v8 }
  0xed   : > { %1204 = vmatmul.msk.bf16.vlgmr.msra.gmra.mxu0 %vm534_vm1, %v1764_v54 }
  0xee   : > { %v524_v56 = vpop.f32.mrf.mxu0 }
  0xef   : > { %804 = vmatpush.bf16.msrb.mxu1 %v1179_v30  ;;  %777 = vmatpush.bf16.msra.mxu3 %v1720_v17  ;;  %v682_v57 = vadd.f32 %v1755_v47, %v524_v56 }
  0xf0   : > { %791 = vmatpush.bf16.msrb.mxu0 %v1722_v21 }
  0xf1   : > { %687 = vrot.lane.b32.xlu2 %v682_v57, %s1516_s18 }
  0xf3   : > { %805 = vmatpush.bf16.msrb.mxu1 %v1159_v33 }
 0x14b   : > { %v688_v50 = vpop.permute.xlu2 %687 }
 0x15b   : > { %v686_v34 = vpop.permute.xlu1 %685 }
 0x163   : > { %v547_v59 = vpop.f32.mrf.mxu1 }
 0x167   : > { %v569_v58 = vpop.f32.mrf.mxu2 }
 0x168   : > { %v570_v60 = vadd.f32 %v569_v58, %v547_v59 }
 0x16a   : > { %v617_v61 = vpop.f32.mrf.mxu0 }
 0x16b   : > { %v549_v5 = vpop.f32.mrf.mxu1 }
 0x16d   : > { %v592_v62 = vpop.f32.mrf.mxu3 }
 0x16e   : > { %v597_v63 = vadd.f32 %v592_v62, %v570_v60 }
 0x16f   : > { %v571_v2 = vpop.f32.mrf.mxu2 }
 0x170   : > { %v622_v1 = vadd.f32 %v617_v61, %v597_v63  ;;  %v572_v6 = vadd.f32 %v571_v2, %v549_v5 }
 0x172   : > { %v634_v4 = vmul.f32 %v1779_v0, %v622_v1  ;;  %v619_v11 = vpop.f32.mrf.mxu0 }
 0x174   : > { %v636_v7 = vadd.f32 %v634_v4, %v1782_v3 }
 0x175   : > { %v594_v8 = vpop.f32.mrf.mxu3 }
 0x176   : > { %v638_v9 = vadd.f32 %v636_v7, %v522_v52  ;;  %v598_v10 = vadd.f32 %v594_v8, %v572_v6 }
 0x178   : > { %v1205_v13 = vmul.f32 -1.442695, %v638_v9  ;;  %v623_v14 = vadd.f32 %v619_v11, %v598_v10 }
 0x17a   : > { %1319 = vpow2.f32 %v1205_v13  ;;  %v635_v16 = vmul.f32 %v1786_v12, %v623_v14 }
 0x17c   : > { %v637_v17 = vadd.f32 %v635_v16, %v1789_v15 }
 0x17e   : > { %v639_v18 = vadd.f32 %v637_v17, %v524_v56 }
 0x180   : > { %v1320_v19 = vpop.eup %1319  ;;  %v1206_v20 = vmul.f32 -1.442695, %v639_v18 }
 0x181   : > { %v646_v21 = vadd.f32 1.0, %v1320_v19 }
 0x182   : > { %1321 = vpow2.f32 %v1206_v20 }
 0x183   : > { %1323 = vrcp.f32 %v646_v21  ;;  %v659_v29 = vand.u32 2147483648, %v646_v21  ;;  %v657_v31 = vand.u32 2147483647, %v646_v21  ;;  %vm653_vm3 = vweird.f32 %v646_v21 }
 0x185   : > { %v660_v35 = vor.u32 1.1754944e-38, %v659_v29  ;;  %vm658_vm5 = vcmp.eq.f32.partialorder %v657_v31, 8.507059e+37 }
 0x188   : > { %v1322_v22 = vpop.eup %1321 }
 0x189   : > { %v1324_v25 = vpop.eup %1323  ;;  %v647_v26 = vadd.f32 1.0, %v1322_v22 }
 0x18a   : > { %v649_v27 = vmul.f32 %v1324_v25, %v646_v21  ;;  %vm654_vm2 = vweird.f32 %v1324_v25 }
 0x18b   : > { %1325 = vrcp.f32 %v647_v26  ;;  %vm655_vm4 = vmor %vm653_vm3, %vm654_vm2  ;;  %v674_v41 = vand.u32 2147483648, %v647_v26  ;;  %v672_v43 = vand.u32 2147483647, %v647_v26  ;;  %vm668_vm7 = vweird.f32 %v647_v26 }
 0x18c   : > { %v650_v28 = vsub.f32 1.0, %v649_v27 }
 0x18d   : > { %v675_v48 = vor.u32 1.1754944e-38, %v674_v41  ;;  %vm673_vm9 = vcmp.eq.f32.partialorder %v672_v43, 8.507059e+37 }
 0x18e   : > { %v651_v30 = vmul.f32 %v1324_v25, %v650_v28 }
 0x190   : > { %v652_v32 = vadd.f32 %v1324_v25, %v651_v30 }
 0x191   : > { %v1326_v33 = vpop.eup %1325 }
 0x192   : > { %v656_v36 = vsel %vm655_vm4, %v1324_v25, %v652_v32  ;;  %v664_v37 = vmul.f32 %v1326_v33, %v647_v26  ;;  %vm669_vm6 = vweird.f32 %v1326_v33 }
 0x193   : > { %v661_v38 = vsel %vm658_vm5, %v660_v35, %v656_v36  ;;  %vm670_vm8 = vmor %vm668_vm7, %vm669_vm6 }
 0x194   : > { %v691_v39 = vmul.f32 %v686_v34, %v661_v38  ;;  %v665_v40 = vsub.f32 1.0, %v664_v37 }
 0x196   : > { %v666_v42 = vmul.f32 %v1326_v33, %v665_v40  ;;  %695 = vrot.lane.b32.xlu2 %v691_v39, %s1516_s18 }
 0x198   : > { %v667_v45 = vadd.f32 %v1326_v33, %v666_v42 }
 0x19a   : > { %v671_v49 = vsel %vm670_vm8, %v1326_v33, %v667_v45 }
 0x19b   : > { %v676_v51 = vsel %vm673_vm9, %v675_v48, %v671_v49 }
 0x19c   : > { %v692_v52 = vmul.f32 %v688_v50, %v676_v51 }
 0x19e   : > { %697 = vrot.lane.b32.xlu1 %v692_v52, %s1516_s18 }
 0x1f0   : > { %v696_v55 = vpop.permute.xlu2 %695 }
 0x1f1   : > { %v701_v56 = vadd.f32 %v696_v55, %v636_v7 }
 0x1f3   : > { %1327 = vtanh.f32 %v701_v56 }
 0x1f9   : > { %v1328_v57 = vpop.eup %1327 }
 0x1fa   : > { %707 = vrot.lane.b32.xlu2 %v1328_v57, %s1516_s18 }
 0x210   : > { %v698_v58 = vpop.permute.xlu1 %697 }
 0x211   : > { %v702_v59 = vadd.f32 %v698_v58, %v637_v17 }
 0x213   : > { %1329 = vtanh.f32 %v702_v59 }
 0x219   : > { %v1330_v60 = vpop.eup %1329 }
 0x21a   : > { %709 = vrot.lane.b32.xlu0 %v1330_v60, %s1516_s18 }
 0x254   : > { %v708_v61 = vpop.permute.xlu2 %707 }
 0x255   : > { %v713_v62 = vsub.f32 %v1724_v23, %v708_v61 }
 0x257   : > { %717 = vrot.lane.b32.xlu1 %v713_v62, %s1518_s23 }
 0x28c   : > { %v710_v63 = vpop.permute.xlu0 %709 }
 0x28d   : > { %v714_v1 = vsub.f32 %v1726_v24, %v710_v63 }
 0x28f   : > { %719 = vrot.lane.b32.xlu2 %v714_v1, %s1518_s23 }
 0x2c9   : > { %v718_v2 = vpop.permute.xlu1 %717 }
 0x2ca   : > { %v723_v4 = vmul.f32 %v718_v2, %v661_v38 }
 0x2cc   : > { %727 = vrot.lane.b32.xlu0 %v723_v4, %s1518_s23 }
 0x2e9   : > { %v720_v5 = vpop.permute.xlu2 %719 }
 0x2ea   : > { %v724_v6 = vmul.f32 %v720_v5, %v676_v51 }
 0x2ec   : > { %729 = vrot.lane.b32.xlu1 %v724_v6, %s1518_s23 }
 0x33e   : > { %v728_v7 = vpop.permute.xlu0 %727 }
 0x33f   : > { %v1803_v9 = vadd.f32 %v1328_v57, %v728_v7 }
 0x35e   : > { %v730_v8 = vpop.permute.xlu1 %729 }
 0x35f   : > { %v1805_v23 = vadd.f32 %v1330_v60, %v730_v8 }
 0x361   : > { %v735_v10 = vpack.c.bf16 %v1805_v23, %v1803_v9 }
 0x363   : > { %737 = vrot.lane.b32.xlu2 %v735_v10, %s1516_s18 }
 0x3bd   : > { %v738_v24 = vpop.permute.xlu2 %737 }
 0x3be   : > { %1207 = vmatmul.msk.bf16.vlgmr.msra.gmra.mxu1 %vm453_vm0, %v738_v24  ;;  %1208 = vmatmul.msk.bf16.vlgmr.msra.gmra.mxu2 %vm453_vm0, %v738_v24 }
 0x3bf   : > { %1209 = vmatmul.msk.bf16.vlgmr.msra.gmra.mxu3 %vm453_vm0, %v738_v24  ;;  %1210 = vmatmul.msk.bf16.vlgmr.msrb.gmra.mxu0 %vm453_vm0, %v738_v24 }
 0x3ce   : > { %1211 = vmatmul.msk.bf16.vlgmr.msrb.gmra.mxu1 %vm453_vm0, %v738_v24 }
 0x43b   : > { %v751_v11 = vpop.f32.mrf.mxu1 }
 0x43c   : > { %v793_v13 = vpop.f32.mrf.mxu0 }
 0x441   : > { %v765_v14 = vpop.f32.mrf.mxu2 }
 0x442   : > { %v779_v16 = vpop.f32.mrf.mxu3 }
 0x443   : > { %v753_v17 = vpop.f32.mrf.mxu1 }
 0x444   : > { %v812_v18 = vpack.c.bf16 %v753_v17, %v751_v11  ;;  %v795_v19 = vpop.f32.mrf.mxu0 }
 0x445   : > { %v859_v20 = vpack.c.bf16 %v795_v19, %v793_v13 }
 0x446   : > { %835 = vmatpush.bf16.msrb.mxu3 %v812_v18 }
 0x447   : > { %867 = vmatpush.bf16.msra.mxu1 %v859_v20 }
 0x449   : > { %v767_v21 = vpop.f32.mrf.mxu2  ;;  %1213 = vmatmul.msk.bf16.vlgmr.msrb.gmra.mxu3 %vm534_vm1, %v1748_v44 }
 0x44a   : > { %v813_v22 = vpack.c.bf16 %v767_v21, %v765_v14  ;;  %v781_v25 = vpop.f32.mrf.mxu3  ;;  %1215 = vmatmul.msk.bf16.vlgmr.msra.gmra.mxu1 %vm534_vm1, %v1764_v54 }
 0x44b   : > { %v842_v26 = vpack.c.bf16 %v781_v25, %v779_v16  ;;  %v807_v27 = vpop.f32.mrf.mxu1 }
 0x44c   : > { %v920_v28 = vadd.f32 %v807_v27, %v1755_v47  ;;  %821 = vmatpush.bf16.msrb.mxu2 %v813_v22 }
 0x44d   : > { %850 = vmatpush.bf16.msra.mxu0 %v842_v26 }
 0x44e   : > { %924 = vrot.lane.b32.xlu0 %v920_v28, %s1516_s18 }
 0x44f   : > { %1212 = vmatmul.msk.bf16.vlgmr.msrb.gmra.mxu2 %vm534_vm1, %v1751_v46 }
 0x450   : > { %1214 = vmatmul.msk.bf16.vlgmr.msra.gmra.mxu0 %vm534_vm1, %v1761_v53 }
 0x453   : > { %v809_v44 = vpop.f32.mrf.mxu1 }
 0x454   : > { %v921_v29 = vadd.f32 %v809_v44, %v1755_v47 }
 0x456   : > { %926 = vrot.lane.b32.xlu1 %v921_v29, %s1516_s18 }
 0x4c0   : > { %v925_v1 = vpop.permute.xlu0 %924 }
 0x4c7   : > { %v869_v33 = vpop.f32.mrf.mxu1 }
 0x4c8   : > { %v927_v13 = vpop.permute.xlu1 %926 }
 0x4cc   : > { %v837_v54 = vpop.f32.mrf.mxu3 }
 0x4cd   : > { %v852_v31 = vpop.f32.mrf.mxu0 }
 0x4cf   : > { %v871_v47 = vpop.f32.mrf.mxu1 }
 0x4d2   : > { %v823_v30 = vpop.f32.mrf.mxu2 }
 0x4d3   : > { %v838_v32 = vadd.f32 %v837_v54, %v823_v30 }
 0x4d4   : > { %v839_v38 = vpop.f32.mrf.mxu3 }
 0x4d5   : > { %v857_v34 = vadd.f32 %v852_v31, %v838_v32  ;;  %v854_v53 = vpop.f32.mrf.mxu0 }
 0x4d7   : > { %v874_v35 = vadd.f32 %v869_v33, %v857_v34 }
 0x4d9   : > { %v876_v36 = vmul.f32 %v874_v35, %v1779_v0 }
 0x4da   : > { %v825_v37 = vpop.f32.mrf.mxu2 }
 0x4db   : > { %v878_v46 = vadd.f32 %v876_v36, %v1782_v3  ;;  %v840_v39 = vadd.f32 %v839_v38, %v825_v37 }
 0x4dd   : > { %v880_v40 = vadd.f32 %v878_v46, %v807_v27  ;;  %v858_v41 = vadd.f32 %v854_v53, %v840_v39 }
 0x4df   : > { %v1216_v42 = vmul.f32 -1.442695, %v880_v40  ;;  %v875_v43 = vadd.f32 %v871_v47, %v858_v41 }
 0x4e1   : > { %1331 = vpow2.f32 %v1216_v42  ;;  %v877_v45 = vmul.f32 %v875_v43, %v1786_v12 }
 0x4e3   : > { %v879_v48 = vadd.f32 %v877_v45, %v1789_v15 }
 0x4e5   : > { %v881_v49 = vadd.f32 %v879_v48, %v809_v44 }
 0x4e7   : > { %v1332_v50 = vpop.eup %1331  ;;  %v1217_v51 = vmul.f32 -1.442695, %v881_v49 }
 0x4e8   : > { %v888_v0 = vadd.f32 1.0, %v1332_v50 }
 0x4e9   : > { %1333 = vpow2.f32 %v1217_v51 }
 0x4ea   : > { %1335 = vrcp.f32 %v888_v0  ;;  %v901_v58 = vand.u32 2147483648, %v888_v0  ;;  %v899_v60 = vand.u32 2147483647, %v888_v0  ;;  %vm895_vm11 = vweird.f32 %v888_v0 }
 0x4ec   : > { %v902_v15 = vor.u32 1.1754944e-38, %v901_v58  ;;  %vm900_vm13 = vcmp.eq.f32.partialorder %v899_v60, 8.507059e+37 }
 0x4ef   : > { %v1334_v52 = vpop.eup %1333 }
 0x4f0   : > { %v1336_v3 = vpop.eup %1335  ;;  %v889_v55 = vadd.f32 1.0, %v1334_v52 }
 0x4f1   : > { %v891_v56 = vmul.f32 %v1336_v3, %v888_v0  ;;  %vm896_vm10 = vweird.f32 %v1336_v3 }
 0x4f2   : > { %1337 = vrcp.f32 %v889_v55  ;;  %vm897_vm12 = vmor %vm895_vm11, %vm896_vm10  ;;  %v916_v6 = vand.u32 2147483648, %v889_v55  ;;  %v914_v8 = vand.u32 2147483647, %v889_v55  ;;  %vm910_vm15 = vweird.f32 %v889_v55 }
 0x4f3   : > { %v892_v57 = vsub.f32 1.0, %v891_v56 }
 0x4f4   : > { %v917_v24 = vor.u32 1.1754944e-38, %v916_v6  ;;  %vm915_vm2 = vcmp.eq.f32.partialorder %v914_v8, 8.507059e+37 }
 0x4f5   : > { %v893_v59 = vmul.f32 %v1336_v3, %v892_v57 }
 0x4f7   : > { %v894_v61 = vadd.f32 %v1336_v3, %v893_v59 }
 0x4f8   : > { %v1338_v12 = vpop.eup %1337 }
 0x4f9   : > { %v898_v62 = vsel %vm897_vm12, %v1336_v3, %v894_v61  ;;  %v906_v63 = vmul.f32 %v1338_v12, %v889_v55  ;;  %vm911_vm14 = vweird.f32 %v1338_v12 }
 0x4fa   : > { %v903_v2 = vsel %vm900_vm13, %v902_v15, %v898_v62  ;;  %vm912_vm1 = vmor %vm910_vm15, %vm911_vm14 }
 0x4fb   : > { %v930_v4 = vmul.f32 %v925_v1, %v903_v2  ;;  %v907_v5 = vsub.f32 1.0, %v906_v63 }
 0x4fd   : > { %934 = vrot.lane.b32.xlu2 %v930_v4, %s1516_s18  ;;  %v908_v7 = vmul.f32 %v1338_v12, %v907_v5 }
 0x4ff   : > { %v909_v10 = vadd.f32 %v1338_v12, %v908_v7 }
 0x501   : > { %v913_v11 = vsel %vm912_vm1, %v1338_v12, %v909_v10 }
 0x502   : > { %v918_v14 = vsel %vm915_vm2, %v917_v24, %v913_v11 }
 0x503   : > { %v931_v16 = vmul.f32 %v927_v13, %v918_v14 }
 0x505   : > { %936 = vrot.lane.b32.xlu0 %v931_v16, %s1516_s18 }
 0x557   : > { %v935_v17 = vpop.permute.xlu2 %934 }
 0x558   : > { %v940_v18 = vadd.f32 %v935_v17, %v878_v46 }
 0x55a   : > { %1339 = vtanh.f32 %v940_v18 }
 0x560   : > { %v1340_v19 = vpop.eup %1339 }
 0x561   : > { %v944_v20 = vsub.f32 %v1803_v9, %v1340_v19 }
 0x563   : > { %948 = vrot.lane.b32.xlu1 %v944_v20, %s1519_s28 }
 0x577   : > { %v937_v21 = vpop.permute.xlu0 %936 }
 0x578   : > { %v941_v22 = vadd.f32 %v937_v21, %v879_v48 }
 0x57a   : > { %1341 = vtanh.f32 %v941_v22 }
 0x580   : > { %v1342_v25 = vpop.eup %1341 }
 0x581   : > { %v945_v26 = vsub.f32 %v1805_v23, %v1342_v25 }
 0x583   : > { %950 = vrot.lane.b32.xlu2 %v945_v26, %s1519_s28 }
 0x5d5   : > { %v949_v27 = vpop.permute.xlu1 %948 }
 0x5d6   : > { %v954_v28 = vmul.f32 %v949_v27, %v903_v2 }
 0x5d8   : > { %958 = vrot.lane.b32.xlu0 %v954_v28, %s1518_s23 }
 0x5dd   : > { %v951_v44 = vpop.permute.xlu2 %950 }
 0x5de   : > { %v955_v29 = vmul.f32 %v951_v44, %v918_v14 }
 0x5e0   : > { %960 = vrot.lane.b32.xlu1 %v955_v29, %s1518_s23 }
 0x64a   : > { %v959_v9 = vpop.permute.xlu0 %958 }
 0x64b   : > { %v964_v54 = vadd.f32 %v1340_v19, %v959_v9 }
 0x64d   : > { %968 = vrot.lane.b32.xlu2 %v964_v54, %s1516_s18 }
 0x652   : > { %v961_v30 = vpop.permute.xlu1 %960 }
 0x653   : > { %v965_v31 = vadd.f32 %v1342_v25, %v961_v30 }
 0x655   : > { %970 = vrot.lane.b32.xlu0 %v965_v31, %s1516_s18 }
 0x6a7   : > { %v969_v23 = vpop.permute.xlu2 %968 }
 0x6a8   : > { %974 = vst.msk [vmem:[%s359_s14] sm:$0xff] %vm453_vm0, %v969_v23 }
 0x6c7   : > { %v971_v32 = vpop.permute.xlu0 %970 }
 0x6c8   : > { %975 = vst.msk [vmem:[%s359_s14 + $0x8] sm:$0xff] %vm453_vm0, %v971_v32 }
 0x6c9   : > { %1460 = shalt.err (!%p1457_p11)
}
 0x6ca   : > { %s1520_s13 = smov 128   ;;  %s1521_s18 = smov 8  }
 0x6cb   : > { %1250 = dma.vmem_to_hbm [thread:$0]  (%p1623_p5), %s990_s20, 256, %s992_s29, %s977_s15, %s1520_s13, %s1520_s13, %s1521_s18  }
 0x6cc PF: > { %p1270_p12 = scmp.ge.s32.totalorder %s1507_s24, 2  ;;  %s1006_s10 = sand.u32 1, %s1495_s21  }
 0x6cd   : > { %s1007_s11 = scalar_lea.sflag [#allocation4], %s1006_s10 }
 0x6ce   : > { %p1264_p13 = pnand %p1270_p12, %p1592_p6 }
 0x6d0   : > { %p1265_p0 = pneg %p1264_p13 }
 0x6d2   : > { %1490 = dma.done.wait (%p1265_p0), %s1007_s11, 256  }
 0x6d3   : > { %1492 = vsyncadd (%p1265_p0), %s1007_s11, 4294967040  ;;  %s1900_s24 = sld [smem:[#allocation15_spill]]  ;;  %s1903_s21 = smov %s1499_s22 }
 0x6d4   : > { %s1901_s23 = sld [smem:[#allocation13_spill]] }
 0x6d5   : > { %s1902_s28 = sld [smem:[#allocation16_spill]] }
 0x6d9   : > { %p22_p3 = scmp.ge.s32.totalorder %s1900_s24, 6  }
 0x6da   : > { %s1904_s22 = smov %s1901_s23 }
 0x6db   : > { %s1905_s23 = smov %s1902_s28  ;;  %24 = sbr.rel (!%p22_p3) target bundleno = 10 (0xa), region = 112 }
 0x6e0   :  { %1013 = vsyncpa [#allocation3], 1 }
 0x6e1   :  { %1015 = vsyncpa [#allocation3 + $0x1], 1 }
 0x6e2   :  { %1016 = vsyncpa [#allocation6], 1 }
 0x6e3   :  { %1018 = vsyncpa [#allocation6 + $0x1], 1 }
 0x6e4   :  { %1019 = vsyncpa [#allocation4], 1 }
 0x6e5   :  { %1021 = vsyncpa [#allocation4 + $0x1], 1 }

</bundles_post_ra>
